<compile_context>
chip_gen: v5e
topology: v5e:2x2
jax: 0.10.0
libtpu: 0.0.40
codegen_flags: <defaults>
</compile_context>

<pallas_src>
import functools

import jax
import jax.numpy as jnp
from jax.experimental import pallas as pl
from jax.experimental.pallas import tpu as pltpu


def _round_up(x, m):
    return ((x + m - 1) // m) * m


def _focal_loss_kernel(x_ref, lab_ref, loss_ref, *, alpha, gamma):
    """Per-row focal loss for one (block_rows, C) tile of logits."""
    x = x_ref[...].astype(jnp.float32)            # (TB, C)
    lab = lab_ref[...]                            # (TB, 1) int32 class ids
    tb, c = x.shape

    # Numerically stable log-softmax pieces over the class axis.
    m = jnp.max(x, axis=-1, keepdims=True)        # (TB, 1)
    shifted = x - m                               # (TB, C)
    sumexp = jnp.sum(jnp.exp(shifted), axis=-1, keepdims=True)
    lse = jnp.log(sumexp)                         # (TB, 1)

    # Select the shifted logit at the target class without a one-hot stream.
    col = jax.lax.broadcasted_iota(jnp.int32, (tb, c), 1)
    shifted_lab = jnp.sum(jnp.where(col == lab, shifted, 0.0),
                          axis=-1, keepdims=True)  # (TB, 1)

    ce = lse - shifted_lab                        # (TB, 1)  = -log p_t  >= 0
    p = jnp.exp(-ce)                              # p_t (EUP)

    one_minus_p = 1.0 - p
    g = float(gamma)
    if g == int(g) and 0 <= int(g) <= 8:
        # Keep the modulating factor on the VPU for the common integer gammas.
        mod = jnp.ones_like(one_minus_p)
        for _ in range(int(g)):
            mod = mod * one_minus_p
    else:
        mod = one_minus_p ** g

    loss_ref[...] = alpha * mod * ce              # (TB, 1) per-example loss


def focal_loss(inputs, labels, *, alpha=1.0, gamma=2.0, reduce=True,
               vmem_block_bytes=4 * 1024 * 1024):
    """Pallas TPU implementation of FocalLoss(alpha, gamma, reduce).

    inputs: [B, C] float logits; labels: [B] integer class ids.
    """
    B, C = inputs.shape
    labels = labels.astype(jnp.int32)

    # Pick the largest row tile under the VMEM budget (multiple of 8 sublanes).
    cap_rows = max(8, (vmem_block_bytes // (C * 4)) // 8 * 8)
    block_rows = min(cap_rows, _round_up(B, 8))
    B_pad = _round_up(B, block_rows)

    if B_pad != B:
        inputs = jnp.pad(inputs, ((0, B_pad - B), (0, 0)))
        labels = jnp.pad(labels, (0, B_pad - B))
    labels2d = labels.reshape(B_pad, 1)

    kernel = functools.partial(_focal_loss_kernel,
                               alpha=float(alpha), gamma=float(gamma))
    grid = (B_pad // block_rows,)

    rows = pl.pallas_call(
        kernel,
        out_shape=jax.ShapeDtypeStruct((B_pad, 1), jnp.float32),
        grid_spec=pltpu.PrefetchScalarGridSpec(
            num_scalar_prefetch=0,
            grid=grid,
            in_specs=[
                pl.BlockSpec((block_rows, C), lambda i: (i, 0)),   # logits
                pl.BlockSpec((block_rows, 1), lambda i: (i, 0)),   # labels
            ],
            out_specs=pl.BlockSpec((block_rows, 1), lambda i: (i, 0)),
        ),
        compiler_params=pltpu.CompilerParams(
            dimension_semantics=("parallel",),   # no cross-step state -> megacore OK
        ),
    )(inputs, labels2d)

    per_example = rows[:B, 0]
    if reduce:
        return jnp.mean(per_example)
    return per_example


def _reference_focal(inputs, labels, alpha=1.0, gamma=2.0):
    logp = jax.nn.log_softmax(inputs.astype(jnp.float32), axis=-1)
    ce = -jnp.take_along_axis(logp, labels[:, None], axis=-1)[:, 0]
    p = jnp.exp(-ce)
    loss = alpha * (1.0 - p) ** gamma * ce
    return jnp.mean(loss)


if __name__ == "__main__":
    key = jax.random.PRNGKey(0)
    k1, k2 = jax.random.split(key)

    B, C = 16, 32  # small classification shapes: batch=16, classes=32
    inputs = jax.random.normal(k1, (B, C), dtype=jnp.float32)
    labels = jax.random.randint(k2, (B,), 0, C, dtype=jnp.int32)

    loss = focal_loss(inputs, labels, alpha=1.0, gamma=2.0, reduce=True)
    loss = jax.block_until_ready(loss)

    ref = _reference_focal(inputs, labels, alpha=1.0, gamma=2.0)
    assert jnp.allclose(loss, ref, atol=1e-5, rtol=1e-5), (loss, ref)

    print("KERNEL_OK")
</pallas_src>

<mosaic_0001>
module attributes {stable_mosaic.version = 11 : i64} {
  func.func @_focal_loss_kernel(%arg0: i32, %arg1: memref<16x32xf32, #tpu.memory_space<vmem>>, %arg2: memref<16x1xi32, #tpu.memory_space<vmem>>, %arg3: memref<16x1xf32, #tpu.memory_space<vmem>>) attributes {dimension_semantics = [#tpu.dimension_semantics<parallel>], iteration_bounds = array<i64: 1>, scalar_prefetch = 0 : i64, scratch_operands = 0 : i64, tpu.core_type = #tpu.core_type<tc>, window_params = [{transform_indices = @transform_0, window_bounds = array<i64: 16, 32>}, {transform_indices = @transform_1, window_bounds = array<i64: 16, 1>}, {transform_indices = @transform_2, window_bounds = array<i64: 16, 1>}]} {
    %c0 = arith.constant 0 : index
    %c0_0 = arith.constant 0 : index
    %0 = vector.load %arg1[%c0, %c0_0] : memref<16x32xf32, #tpu.memory_space<vmem>>, vector<16x32xf32>
    %c0_1 = arith.constant 0 : index
    %c0_2 = arith.constant 0 : index
    %1 = vector.load %arg2[%c0_1, %c0_2] : memref<16x1xi32, #tpu.memory_space<vmem>>, vector<16x1xi32>
    %cst = arith.constant dense<0xFF800000> : vector<16xf32>
    %2 = vector.multi_reduction <maximumf>, %0, %cst [1] : vector<16x32xf32> to vector<16xf32>
    %3 = vector.shape_cast %2 : vector<16xf32> to vector<16x1xf32>
    %4 = vector.broadcast %3 : vector<16x1xf32> to vector<16x32xf32>
    %5 = arith.subf %0, %4 : vector<16x32xf32>
    %6 = math.exp %5 : vector<16x32xf32>
    %cst_3 = arith.constant dense<0.000000e+00> : vector<16xf32>
    %7 = vector.multi_reduction <add>, %6, %cst_3 [1] : vector<16x32xf32> to vector<16xf32>
    %8 = vector.shape_cast %7 : vector<16xf32> to vector<16x1xf32>
    %9 = math.log %8 : vector<16x1xf32>
    %10 = tpu.iota {dimensions = array<i32: 1>} : vector<16x32xi32>
    %11 = vector.broadcast %1 : vector<16x1xi32> to vector<16x32xi32>
    %12 = arith.cmpi eq, %10, %11 : vector<16x32xi32>
    %cst_4 = arith.constant 0.000000e+00 : f32
    %13 = vector.broadcast %cst_4 : f32 to vector<16x32xf32>
    %14 = arith.select %12, %5, %13 : vector<16x32xi1>, vector<16x32xf32>
    %cst_5 = arith.constant dense<0.000000e+00> : vector<16xf32>
    %15 = vector.multi_reduction <add>, %14, %cst_5 [1] : vector<16x32xf32> to vector<16xf32>
    %16 = vector.shape_cast %15 : vector<16xf32> to vector<16x1xf32>
    %17 = arith.subf %9, %16 : vector<16x1xf32>
    %cst_6 = arith.constant 0.000000e+00 : f32
    %18 = vector.broadcast %cst_6 : f32 to vector<16x1xf32>
    %19 = arith.subf %18, %17 : vector<16x1xf32>
    %20 = math.exp %19 : vector<16x1xf32>
    %cst_7 = arith.constant 1.000000e+00 : f32
    %21 = vector.broadcast %cst_7 : f32 to vector<16x1xf32>
    %22 = arith.subf %21, %20 : vector<16x1xf32>
    %cst_8 = arith.constant 1.000000e+00 : f32
    %23 = vector.broadcast %cst_8 : f32 to vector<16x1xf32>
    %24 = arith.mulf %23, %22 : vector<16x1xf32>
    %25 = arith.mulf %24, %22 : vector<16x1xf32>
    %cst_9 = arith.constant 1.000000e+00 : f32
    %26 = vector.broadcast %cst_9 : f32 to vector<16x1xf32>
    %27 = arith.mulf %26, %25 : vector<16x1xf32>
    %28 = arith.mulf %27, %17 : vector<16x1xf32>
    %c0_10 = arith.constant 0 : index
    %c0_11 = arith.constant 0 : index
    %29 = vector.load %arg3[%c0_10, %c0_11] : memref<16x1xf32, #tpu.memory_space<vmem>>, vector<16x1xf32>
    tpu.vector_store %arg3[%c0_10, %c0_11], %28 {strides = array<i32>} : memref<16x1xf32, #tpu.memory_space<vmem>>, vector<16x1xf32>,
    return
  }
  func.func @transform_0(%arg0: i32) -> (i32, i32) {
    %c0_i32 = arith.constant 0 : i32
    %c0_i32_0 = arith.constant 0 : i32
    return %arg0, %c0_i32 : i32, i32
  }
  func.func @transform_1(%arg0: i32) -> (i32, i32) {
    %c0_i32 = arith.constant 0 : i32
    %c0_i32_0 = arith.constant 0 : i32
    return %arg0, %c0_i32 : i32, i32
  }
  func.func @transform_2(%arg0: i32) -> (i32, i32) {
    %c0_i32 = arith.constant 0 : i32
    %c0_i32_0 = arith.constant 0 : i32
    return %arg0, %c0_i32 : i32, i32
  }
}

</mosaic_0001>

<bundles_post_ra>
// kernel: tpu_custom_call.1
= control target key start
LH: loop header
LB: loop body
LE: loop exit
PB: predicated region body
PF: predicated region fallthrough
CT: control target
= control target key end

     0   :  { %vm15_vm0 = vcmask 261120   ;;  %v92_v1 = vmov 0   ;;  %v38_v7 = vlaneseq  ;;  %vm70_vm3 = vcmask 7168   ;;  %s132_s0 = inlined_call_operand.vmem [shape: f32[16,32], index: 0, kind: input, shape index: {}]   ;;  %s133_s1 = inlined_call_operand.vmem [shape: s32[16,1], index: 1, kind: input, shape index: {}]   ;;  %s134_s2 = inlined_call_operand.vmem [shape: f32[16,1], index: 2, kind: output, shape index: {}]  }
   0x1   :  { %v11_v0 = vld [vmem:[%s132_s0] sm:$0xff]  ;;  %78 = vset.pattern.permute.xlu1 %v92_v1  ;;  %79 = vset.pattern.permute.xlu0 %v92_v1  ;;  %v12_v4 = vld [vmem:[%s132_s0 + $0x8] sm:$0xff] }
   0x2   :  { %v13_v2 = vld [vmem:[%s133_s1] sm:$0xff]  ;;  %v16_v3 = vsel %vm15_vm0, %v11_v0, -inf  ;;  %v14_v5 = vld [vmem:[%s133_s1 + $0x8] sm:$0xff]  ;;  %v19_v6 = vsel %vm15_vm0, %v12_v4, -inf  ;;  %v39_v8 = vand.u32 127, %v38_v7 }
   0x3   :  { %41 = vperm.xlu1 %78, %v13_v2   ;;  %17 = vmax.xlane.f32.xlu0 %v16_v3 }
   0xb   :  { %44 = vperm.xlu1 %78, %v14_v5   ;;  %20 = vmax.xlane.f32.xlu0 %v19_v6 }
  0x75   :  { %v42_v9 = vpop.permute.xlu1 %41 }
  0x76   :  { %v18_v10 = vpop.xlane.xlu0 %17  ;;  %vm46_vm1 = vcmp.eq.s32.totalorder %v39_v8, %v42_v9 }
  0x77   :  { %v22_v11 = vsub.f32 %v11_v0, %v18_v10 }
  0x79   :  { %v24_v12 = vmul.f32 1.442695, %v22_v11  ;;  %v48_v13 = vsel %vm46_vm1, %v22_v11, 0.0 }
  0x7a   :  { %v50_v14 = vsel %vm15_vm0, %v48_v13, 0.0 }
  0x7b   :  { %80 = vpow2.f32 %v24_v12  ;;  %51 = vadd.xlane.f32.xlu0 %v50_v14 }
  0x7d   :  { %v45_v15 = vpop.permute.xlu1 %44 }
  0x7e   :  { %v21_v16 = vpop.xlane.xlu0 %20  ;;  %vm47_vm2 = vcmp.eq.s32.totalorder %v39_v8, %v45_v15 }
  0x7f   :  { %v23_v17 = vsub.f32 %v12_v4, %v21_v16 }
  0x81   :  { %v81_v18 = vpop.eup %80  ;;  %v26_v19 = vmul.f32 1.442695, %v23_v17  ;;  %v49_v20 = vsel %vm47_vm2, %v23_v17, 0.0 }
  0x82   :  { %v28_v21 = vsel %vm15_vm0, %v81_v18, 0.0  ;;  %v53_v22 = vsel %vm15_vm0, %v49_v20, 0.0 }
  0x83   :  { %82 = vpow2.f32 %v26_v19  ;;  %29 = vadd.xlane.f32.xlu2 %v28_v21  ;;  %54 = vadd.xlane.f32.xlu1 %v53_v22 }
  0x89   :  { %v83_v23 = vpop.eup %82 }
  0x8a   :  { %v31_v24 = vsel %vm15_vm0, %v83_v23, 0.0 }
  0x8b   :  { %32 = vadd.xlane.f32.xlu2 %v31_v24 }
  0xee   :  { %v52_v29 = vpop.xlane.xlu0 %51 }
  0xf6   :  { %v30_v25 = vpop.xlane.xlu2 %29  ;;  %v55_v35 = vpop.xlane.xlu1 %54 }
  0xf7   :  { %84 = vlog2.f32 %v30_v25 }
  0xfd   :  { %v85_v26 = vpop.eup %84 }
  0xfe   :  { %v35_v27 = vmul.f32 0.6931472, %v85_v26  ;;  %v33_v28 = vpop.xlane.xlu2 %32 }
  0xff   :  { %86 = vlog2.f32 %v33_v28 }
 0x100   :  { %v56_v30 = vsub.f32 %v35_v27, %v52_v29 }
 0x102   :  { %v58_v31 = vsub.f32 0.0, %v56_v30 }
 0x104   :  { %v60_v32 = vmul.f32 1.442695, %v58_v31 }
 0x105   :  { %v87_v33 = vpop.eup %86 }
 0x106   :  { %88 = vpow2.f32 %v60_v32  ;;  %v37_v34 = vmul.f32 0.6931472, %v87_v33 }
 0x108   :  { %v57_v36 = vsub.f32 %v37_v34, %v55_v35 }
 0x10a   :  { %v59_v37 = vsub.f32 0.0, %v57_v36 }
 0x10c   :  { %v89_v38 = vpop.eup %88  ;;  %v62_v39 = vmul.f32 1.442695, %v59_v37 }
 0x10d   :  { %v64_v40 = vsub.f32 1.0, %v89_v38 }
 0x10e   :  { %90 = vpow2.f32 %v62_v39 }
 0x10f   :  { %v66_v41 = vmul.f32 %v64_v40, %v64_v40 }
 0x111   :  { %v68_v42 = vmul.f32 %v66_v41, %v56_v30 }
 0x113   :  { %71 = vst.msk [vmem:[%s134_s2] sm:$0xff] %vm70_vm3, %v68_v42 }
 0x114   :  { %v91_v43 = vpop.eup %90 }
 0x115   :  { %v65_v44 = vsub.f32 1.0, %v91_v43 }
 0x117   :  { %v67_v45 = vmul.f32 %v65_v44, %v65_v44 }
 0x119   :  { %v69_v46 = vmul.f32 %v67_v45, %v57_v36 }
 0x11b   :  { %72 = vst.msk [vmem:[%s134_s2 + $0x8] sm:$0xff] %vm70_vm3, %v69_v46 }

</bundles_post_ra>
